<compile_context>
chip_gen: v7x
topology: tpu7x:2x2x1
jax: 0.10.0
libtpu: 0.0.40
codegen_flags: <defaults>
</compile_context>

<pallas_src>
import functools

import jax
import jax.numpy as jnp
from jax.experimental import pallas as pl
from jax.experimental.pallas import tpu as pltpu

EPS = 1e-5  # torch.nn.LayerNorm default


def prenorm_kernel(x_ref, gamma_ref, w_ref, b_ref, o_ref, y_ref, *, d_true):
    """Grid = (row_tiles, n_tiles).
    x_ref: (tm, D_pad), gamma_ref: (1, D_pad) f32, w_ref: (D_pad, tn) bf16,
    b_ref: (1, tn) f32 fused bias (beta @ W + b), o_ref: (tm, tn),
    y_ref: VMEM scratch (tm, D_pad) bf16 holding LayerNorm(x)*gamma for this
    row tile (reused across all weight column tiles)."""
    j = pl.program_id(1)

    # ---- LayerNorm once per row tile (reused across all N tiles) ----
    @pl.when(j == 0)
    def _():
        x = x_ref[...].astype(jnp.float32)
        inv_d = 1.0 / d_true
        # One-pass stats: padded columns of x are zero, so they contribute 0
        # to both sums; both cross-lane reductions can issue concurrently.
        s1 = jnp.sum(x, axis=-1, keepdims=True)
        s2 = jnp.sum(x * x, axis=-1, keepdims=True)
        mean = s1 * inv_d
        var = jnp.maximum(s2 * inv_d - mean * mean, 0.0)
        inv = jax.lax.rsqrt(var + EPS)
        scale = inv * gamma_ref[...]              # fold gamma into the scale;
        y_ref[...] = ((x - mean) * scale).astype(y_ref.dtype)  # gamma_pad==0
                                                  # zeroes the padded columns.

    # ---- fn: Linear(dim, dim) column tile on the MXU (bf16 in, f32 acc) ----
    out = jnp.dot(y_ref[...], w_ref[...], preferred_element_type=jnp.float32)
    out = out + b_ref[...]                        # fused f32 bias: beta@W + b
    o_ref[...] = out.astype(o_ref.dtype)


def _round_up(x, m):
    return (x + m - 1) // m * m


def _default_vmem_budget():
    """Per-generation scoped-VMEM budget: ~96 MiB on v5e/v6e (128 MiB
    physical), <=48 MiB on v7x (64 MiB physical)."""
    try:
        cap = pltpu.get_tpu_info().vmem_capacity_bytes
    except Exception:
        return 48 * 1024 * 1024
    if cap >= 100 * 1024 * 1024:
        return 96 * 1024 * 1024
    return min(48 * 1024 * 1024, int(cap * 3) // 4)


def prenorm_linear_prepare(gamma, beta, w, b):
    """One-time parameter preprocessing (hoisted out of the forward path):
    lane-dense zero-padding, bf16 cast of W, and beta folded through W into an
    f32 fused bias b' = beta @ W + b."""
    D = w.shape[0]
    D_pad = _round_up(D, 128)
    pd = D_pad - D
    b_fused = (beta.astype(jnp.float32) @ w.astype(jnp.float32)
               + b.astype(jnp.float32))                    # (1, D) f32
    gamma_p = jnp.pad(gamma.astype(jnp.float32), ((0, 0), (0, pd)))
    w_p = jnp.pad(w, ((0, pd), (0, pd))).astype(jnp.bfloat16)
    b_p = jnp.pad(b_fused, ((0, 0), (0, pd)))
    return gamma_p, w_p, b_p


def prenorm_linear(x, gamma_p, w_p, b_p, *, row_tile=512, n_tile=512,
                   vmem_budget=None):
    """x: (B, S, D) -> (B, S, D). LayerNorm(D) then Linear(D, D).
    gamma_p/w_p/b_p come from prenorm_linear_prepare."""
    B, S, D = x.shape
    rows = B * S
    D_pad = w_p.shape[0]
    if vmem_budget is None:
        vmem_budget = _default_vmem_budget()

    x_bytes = jnp.dtype(x.dtype).itemsize
    o_bytes = x_bytes

    # ---- Resident-W decision: DMA W once when it fits comfortably ----
    w_resident_bytes = 2 * D_pad * D_pad * 2       # conservative: 2 buffers
    resident = w_resident_bytes <= vmem_budget // 2
    if resident:
        tn = D_pad
    else:
        tn = n_tile if D_pad % n_tile == 0 else (256 if D_pad % 256 == 0 else 128)
        tn = min(tn, D_pad)

    # ---- Row tile: as large as the VMEM budget allows ----
    def vmem_use(tm):
        use = (2 * tm * D_pad * x_bytes      # x blocks (double-buffered)
               + tm * D_pad * 2              # bf16 LN scratch
               + 2 * tm * tn * o_bytes)      # out blocks (double-buffered)
        use += w_resident_bytes if resident else 3 * D_pad * tn * 2
        return use

    tm = min(_round_up(rows, 8), max(8, (row_tile // 8) * 8))
    while tm > 8 and vmem_use(tm) > vmem_budget:
        tm = max(8, ((tm // 2) // 8) * 8)

    # Pad rows to a multiple of tm so the final block never reads past the
    # array (padded rows are zeros -> finite LN, results sliced off below).
    rows_pad = _round_up(rows, tm)

    x2 = x.reshape(rows, D)
    if rows_pad != rows or D_pad != D:             # skip the copy when aligned
        x2 = jnp.pad(x2, ((0, rows_pad - rows), (0, D_pad - D)))

    grid = (rows_pad // tm, D_pad // tn)

    if resident:
        # Constant block index -> W is copied HBM->VMEM exactly once.
        w_spec = pl.BlockSpec((D_pad, tn), lambda i, j: (0, 0))
    else:
        # Streamed column tiles; triple-buffer to hide the W DMA behind the
        # heavier j==0 (LayerNorm) step of each row tile.
        w_spec = pl.BlockSpec((D_pad, tn), lambda i, j: (0, j),
                              pipeline_mode=pl.Buffered(3))

    out2 = pl.pallas_call(
        functools.partial(prenorm_kernel, d_true=D),
        out_shape=jax.ShapeDtypeStruct((rows_pad, D_pad), x.dtype),
        grid_spec=pltpu.PrefetchScalarGridSpec(
            num_scalar_prefetch=0,
            grid=grid,
            in_specs=[
                pl.BlockSpec((tm, D_pad), lambda i, j: (i, 0)),   # x rows
                pl.BlockSpec((1, D_pad), lambda i, j: (0, 0)),    # gamma (f32)
                w_spec,                                           # W (bf16)
                pl.BlockSpec((1, tn), lambda i, j: (0, j)),       # fused bias
            ],
            out_specs=pl.BlockSpec((tm, tn), lambda i, j: (i, j)),
            scratch_shapes=[pltpu.VMEM((tm, D_pad), jnp.bfloat16)],
        ),
        compiler_params=pltpu.CompilerParams(
            dimension_semantics=("parallel", "arbitrary"),
            vmem_limit_bytes=vmem_budget,
        ),
    )(x2, gamma_p, w_p, b_p)

    return out2[:rows, :D].reshape(B, S, D)


def reference(x, gamma, beta, w, b):
    xf = x.astype(jnp.float32)
    mean = jnp.mean(xf, axis=-1, keepdims=True)
    var = jnp.mean((xf - mean) ** 2, axis=-1, keepdims=True)
    y = (xf - mean) * jax.lax.rsqrt(var + EPS) * gamma[0] + beta[0]
    return (y @ w + b[0]).astype(x.dtype)


if __name__ == "__main__":
    B, S, D = 2, 16, 32
    key = jax.random.PRNGKey(0)
    kx, kw, kb, kg, kbt = jax.random.split(key, 5)

    x = jax.random.normal(kx, (B, S, D), dtype=jnp.float32)

    # LayerNorm affine params (kept 2D for TPU layout).
    gamma = 1.0 + 0.1 * jax.random.normal(kg, (1, D), dtype=jnp.float32)
    beta = 0.05 * jax.random.normal(kbt, (1, D), dtype=jnp.float32)

    # Deterministic Linear(dim, dim) params for the wrapped fn.
    w = jax.random.normal(kw, (D, D), dtype=jnp.float32) * (1.0 / jnp.sqrt(D))
    b = jax.random.normal(kb, (1, D), dtype=jnp.float32) * 0.01

    # One-time parameter prep (pad + bf16 W + fused f32 bias), off the hot path.
    gamma_p, w_p, b_p = prenorm_linear_prepare(gamma, beta, w, b)

    # Small row tile so the demo exercises a multi-step pipelined grid while
    # keeping W resident (single DMA, constant block index).
    out = prenorm_linear(x, gamma_p, w_p, b_p, row_tile=16)
    out = jax.block_until_ready(out)

    ref = reference(x, gamma, beta, w, b)
    assert out.shape == (B, S, D)
    # bf16 MXU feed with f32 accumulation => ~1e-3-level error vs f32 reference.
    assert jnp.allclose(out, ref, atol=3e-2, rtol=3e-2), float(
        jnp.max(jnp.abs(out - ref)))

    print("KERNEL_OK")
</pallas_src>

<mosaic_0001>
module attributes {stable_mosaic.version = 11 : i64} {
  func.func @prenorm_kernel(%arg0: i32, %arg1: i32, %arg2: memref<16x128xf32, #tpu.memory_space<vmem>>, %arg3: memref<1x128xf32, #tpu.memory_space<vmem>>, %arg4: memref<128x128xbf16, #tpu.memory_space<vmem>>, %arg5: memref<1x128xf32, #tpu.memory_space<vmem>>, %arg6: memref<16x128xf32, #tpu.memory_space<vmem>>, %arg7: memref<16x128xbf16, #tpu.memory_space<vmem>>) attributes {dimension_semantics = [#tpu.dimension_semantics<parallel>, #tpu.dimension_semantics<arbitrary>], iteration_bounds = array<i64: 2, 1>, scalar_prefetch = 0 : i64, scratch_operands = 1 : i64, tpu.core_type = #tpu.core_type<tc>, window_params = [{transform_indices = @transform_0, window_bounds = array<i64: 16, 128>}, {pipeline_mode = #tpu.pipeline_mode<synchronous>, transform_indices = @transform_1, window_bounds = array<i64: 1, 128>}, {pipeline_mode = #tpu.pipeline_mode<synchronous>, transform_indices = @transform_2, window_bounds = array<i64: 128, 128>}, {transform_indices = @transform_3, window_bounds = array<i64: 1, 128>}, {transform_indices = @transform_4, window_bounds = array<i64: 16, 128>}]} {
    %c0_i32 = arith.constant 0 : i32
    %0 = arith.cmpi eq, %arg1, %c0_i32 : i32
    %1 = arith.extui %0 : i1 to i32
    %c0_i32_0 = arith.constant 0 : i32
    %2 = arith.cmpi ne, %1, %c0_i32_0 : i32
    scf.if %2 {
      %c0_8 = arith.constant 0 : index
      %c0_9 = arith.constant 0 : index
      %10 = vector.load %arg2[%c0_8, %c0_9] : memref<16x128xf32, #tpu.memory_space<vmem>>, vector<16x128xf32>
      %cst_10 = arith.constant dense<0.000000e+00> : vector<16xf32>
      %11 = vector.multi_reduction <add>, %10, %cst_10 [1] : vector<16x128xf32> to vector<16xf32>
      %12 = vector.shape_cast %11 : vector<16xf32> to vector<16x1xf32>
      %13 = arith.mulf %10, %10 : vector<16x128xf32>
      %cst_11 = arith.constant dense<0.000000e+00> : vector<16xf32>
      %14 = vector.multi_reduction <add>, %13, %cst_11 [1] : vector<16x128xf32> to vector<16xf32>
      %15 = vector.shape_cast %14 : vector<16xf32> to vector<16x1xf32>
      %cst_12 = arith.constant 3.125000e-02 : f32
      %16 = vector.broadcast %cst_12 : f32 to vector<16x1xf32>
      %17 = arith.mulf %12, %16 : vector<16x1xf32>
      %cst_13 = arith.constant 3.125000e-02 : f32
      %18 = vector.broadcast %cst_13 : f32 to vector<16x1xf32>
      %19 = arith.mulf %15, %18 : vector<16x1xf32>
      %20 = arith.mulf %17, %17 : vector<16x1xf32>
      %21 = arith.subf %19, %20 : vector<16x1xf32>
      %cst_14 = arith.constant 0.000000e+00 : f32
      %22 = vector.broadcast %cst_14 : f32 to vector<16x1xf32>
      %23 = arith.maximumf %21, %22 : vector<16x1xf32>
      %cst_15 = arith.constant 9.99999974E-6 : f32
      %24 = vector.broadcast %cst_15 : f32 to vector<16x1xf32>
      %25 = arith.addf %23, %24 : vector<16x1xf32>
      %26 = math.rsqrt %25 : vector<16x1xf32>
      %c0_16 = arith.constant 0 : index
      %c0_17 = arith.constant 0 : index
      %27 = vector.load %arg3[%c0_16, %c0_17] : memref<1x128xf32, #tpu.memory_space<vmem>>, vector<1x128xf32>
      %28 = vector.broadcast %26 : vector<16x1xf32> to vector<16x128xf32>
      %29 = vector.broadcast %27 : vector<1x128xf32> to vector<16x128xf32>
      %30 = arith.mulf %28, %29 : vector<16x128xf32>
      %31 = vector.broadcast %17 : vector<16x1xf32> to vector<16x128xf32>
      %32 = arith.subf %10, %31 : vector<16x128xf32>
      %33 = arith.mulf %32, %30 : vector<16x128xf32>
      %34 = arith.truncf %33 : vector<16x128xf32> to vector<16x128xbf16>
      %c0_18 = arith.constant 0 : index
      %c0_19 = arith.constant 0 : index
      %35 = vector.load %arg7[%c0_18, %c0_19] : memref<16x128xbf16, #tpu.memory_space<vmem>>, vector<16x128xbf16>
      tpu.vector_store %arg7[%c0_18, %c0_19], %34 {strides = array<i32>} : memref<16x128xbf16, #tpu.memory_space<vmem>>, vector<16x128xbf16>,
    } else {
    }
    %c0 = arith.constant 0 : index
    %c0_1 = arith.constant 0 : index
    %3 = vector.load %arg7[%c0, %c0_1] : memref<16x128xbf16, #tpu.memory_space<vmem>>, vector<16x128xbf16>
    %c0_2 = arith.constant 0 : index
    %c0_3 = arith.constant 0 : index
    %4 = vector.load %arg4[%c0_2, %c0_3] : memref<128x128xbf16, #tpu.memory_space<vmem>>, vector<128x128xbf16>
    %cst = arith.constant dense<0.000000e+00> : vector<16x128xf32>
    %5 = tpu.matmul %3, %4, %cst {dimension_numbers = #tpu.dot_dimension_numbers<[1], [0], [0], [1], [0, 0, 1, 1], [], []>} : vector<16x128xbf16>, vector<128x128xbf16>, vector<16x128xf32> -> vector<16x128xf32>
    %c0_4 = arith.constant 0 : index
    %c0_5 = arith.constant 0 : index
    %6 = vector.load %arg5[%c0_4, %c0_5] : memref<1x128xf32, #tpu.memory_space<vmem>>, vector<1x128xf32>
    %7 = vector.broadcast %6 : vector<1x128xf32> to vector<16x128xf32>
    %8 = arith.addf %5, %7 : vector<16x128xf32>
    %c0_6 = arith.constant 0 : index
    %c0_7 = arith.constant 0 : index
    %9 = vector.load %arg6[%c0_6, %c0_7] : memref<16x128xf32, #tpu.memory_space<vmem>>, vector<16x128xf32>
    tpu.vector_store %arg6[%c0_6, %c0_7], %8 {strides = array<i32>} : memref<16x128xf32, #tpu.memory_space<vmem>>, vector<16x128xf32>,
    return
  }
  func.func @transform_0(%arg0: i32, %arg1: i32) -> (i32, i32) {
    %c0_i32 = arith.constant 0 : i32
    %c0_i32_0 = arith.constant 0 : i32
    return %arg0, %c0_i32 : i32, i32
  }
  func.func @transform_1(%arg0: i32, %arg1: i32) -> (i32, i32) {
    %c0_i32 = arith.constant 0 : i32
    %c0_i32_0 = arith.constant 0 : i32
    %c0_i32_1 = arith.constant 0 : i32
    return %c0_i32, %c0_i32_0 : i32, i32
  }
  func.func @transform_2(%arg0: i32, %arg1: i32) -> (i32, i32) {
    %c0_i32 = arith.constant 0 : i32
    %c0_i32_0 = arith.constant 0 : i32
    %c0_i32_1 = arith.constant 0 : i32
    return %c0_i32, %c0_i32_0 : i32, i32
  }
  func.func @transform_3(%arg0: i32, %arg1: i32) -> (i32, i32) {
    %c0_i32 = arith.constant 0 : i32
    %c0_i32_0 = arith.constant 0 : i32
    return %c0_i32, %arg1 : i32, i32
  }
  func.func @transform_4(%arg0: i32, %arg1: i32) -> (i32, i32) {
    %c0_i32 = arith.constant 0 : i32
    return %arg0, %arg1 : i32, i32
  }
}

</mosaic_0001>

<bundles_post_ra>
// kernel: tpu_custom_call.1
= control target key start
LH: loop header
LB: loop body
LE: loop exit
PB: predicated region body
PF: predicated region fallthrough
CT: control target
= control target key end

     0   :  { %9 = vsyncpa [#allocation4], 0  ;;  %s1105_s0 = inlined_call_operand.hbm [shape: f32[32,128], index: 0, kind: input, shape index: {}]   ;;  %s1106_s1 = inlined_call_operand.vmem [shape: f32[1,128], index: 1, kind: input, shape index: {}]   ;;  %s1107_s2 = inlined_call_operand.hbm [shape: bf16[128,128], index: 2, kind: input, shape index: {}]   ;;  %s1108_s3 = inlined_call_operand.vmem [shape: f32[1,128], index: 3, kind: input, shape index: {}]   ;;  %s1109_s4 = inlined_call_operand.hbm [shape: f32[32,128], index: 4, kind: output, shape index: {}]  }
   0x1   :  { %11 = vsyncpa [#allocation4 + $0x1], 0 }
   0x2   :  { %12 = vsyncpa [#allocation7], 0 }
   0x3   :  { %13 = vsyncpa [#allocation5], 0 }
   0x4   :  { %15 = vsyncpa [#allocation5 + $0x1], 0  ;;  %s876_s15 = smov 0   ;;  %s878_s16 = smov 0  }
   0x5   :  { %s880_s17 = smov 0   ;;  %s882_s18 = smov 0  }
   0x6   :  { %s884_s19 = smov 0   ;;  %s886_s20 = smov 0  }
   0x7 LB: > { %s542_s21 = sadd.s32 4294967295, %s838_s20   ;;  %s543_s22 = sadd.s32 4294967294, %s838_s20   ;;  %s838_s20 = sphi %s886_s20, %s21_s20   ;;  %s834_s19 = sphi %s884_s19, %s1133_s19   ;;  %s830_s18 = sphi %s882_s18, %s1132_s18   ;;  %s826_s17 = sphi %s880_s17, %s1131_s17   ;;  %s822_s16 = sphi %s878_s16, %s1130_s16   ;;  %s818_s15 = sphi %s876_s15, %s1129_s15  }
   0x8   : > { %p53_p0 = scmp.ne.s32.totalorder %s822_s16, %s818_s15  ;;  %p910_p1 = scmp.eq.s32.totalorder %s542_s21, 0 }
   0x9   : > { %p914_p2 = scmp.eq.s32.totalorder %s542_s21, 1  ;;  %p153_p3 = scmp.eq.s32.totalorder %s543_s22, 1 }
   0xa   : > { %s1114_s23 = scalar_select %p910_p1, 1, 0 }
   0xb   : > { %s1115_s24 = scalar_select %p914_p2, 1, 0 }
   0xc   : > { %p920_p4 = por %p910_p1, %p53_p0  ;;  %p544_p5 = scmp.ge.s32.totalorder %s838_s20, 1 }
   0xd   : > { %p925_p6 = por %p153_p3, %p53_p0  ;;  %p160_p7 = scmp.lt.s32.totalorder %s838_s20, 3 }
   0xe   : > { %s1116_s25 = scalar_select %p920_p4, 1, 0 }
   0xf   : > { %s1117_s26 = scalar_select %p925_p6, 1, 0 }
  0x10   : > { %p930_p8 = pnand %p544_p5, %p160_p7  ;;  %s840_s28 = smov [#allocation6]  }
  0x11   : > { %s175_s29 = sshll.u32 %s840_s28, 4  ;;  %s33_s5 = sadd.s32 1, %s834_s19  ;;  %s176_s29 = int_to_ptr.vmem [resolvable:$true] %s175_s29 }
  0x12   : > { %s1118_s27 = scalar_select %p930_p8, 1, 0 }
  0x13   : > { %p609_p9 = pneg %p930_p8  ;;  %s694_s8 = scalar_lea.hbm %s1107_s2, 1024 }
  0x14   : > { %p695_p12 = scmp.ne.s32.totalorder %s1107_s2, %s694_s8  ;;  %p701_p5 = scmp.lt.u32.totalorder %s694_s8, %s1107_s2 }
  0x15   : > { %p939_p11 = pnand %p609_p9, %p910_p1 }
  0x17   : > { %p696_p13 = pneg %p939_p11 }
  0x19   : > { %p697_p0 = pnand %p696_p13, %p695_p12 }
  0x1b   : > { %p698_p3 = pneg %p697_p0 }
  0x1d   : > { %p703_p7 = pnand %p701_p5, %p698_p3 }
  0x1f   : > { %706 = shalt.err (!%p703_p7)
}
  0x20   : > { %s707_s13 = scalar_lea.vmem %s176_s29, 1024  ;;  %p715_p1 = scmp.lt.s32.totalorder %s176_s29, %s176_s29 }
  0x21   : > { %p708_p9 = scmp.ne.s32.totalorder %s176_s29, %s707_s13  ;;  %p716_p4 = scmp.lt.s32.totalorder %s707_s13, %s707_s13 }
  0x23   : > { %p710_p10 = pnand %p708_p9, %p696_p13  ;;  %p717_p8 = por %p716_p4, %p715_p1 }
  0x25   : > { %p711_p6 = pneg %p710_p10 }
  0x27   : > { %p718_p2 = pnand %p717_p8, %p711_p6 }
  0x29   : > { %721 = shalt.err (!%p718_p2)
}
  0x2a   : > { %s841_s14 = smov 64   ;;  %s842_s21 = smov 4  }
  0x2b   : > { %612 = dma.hbm_to_vmem [thread:$0]  (!%p939_p11), %s1107_s2, 1024, %s176_s29, [#allocation7], %s841_s14, %s841_s14, %s842_s21  }
  0x2c   : > { %p35_p1 = scmp.ge.s32.totalorder %s33_s5, 2  ;;  %s40_s6 = sadd.s32 1, %s826_s17 }
  0x2d   : > { %p47_p2 = scmp.ne.s32.totalorder %s826_s17, %s822_s16  ;;  %p48_p4 = scmp.eq.s32.totalorder %s838_s20, 0 }
  0x2e   : > { %s1135_s5 = smov (%p35_p1, %s33_s5), 0  ;;  %p1121_p8 = scmp.ne.s32.totalorder %s1115_s24, 0 }
  0x2f   : > { %p966_p6 = por %p48_p4, %p47_p2  ;;  %s37_s30 = ssub.s32 %s834_s19, %s1135_s5 }
  0x30   : > { %p972_p10 = por %p1121_p8, %p47_p2  ;;  %p622_p12 = scmp.lt.s32.totalorder %s838_s20, 2 }
  0x31   : > { %p38_p11 = scmp.eq.s32.totalorder %s37_s30, 0  ;;  %s195_s29 = sand.u32 1, %s826_s17  }
  0x32   : > { %s548_s9 = sshll.u32 %s195_s29, 4  ;;  %s570_s11 = sshll.u32 %s834_s19, 8 }
  0x33   : > { %s981_s10 = scalar_select %p38_p11, %s826_s17, %s40_s6  }
  0x34   : > { %s987_s14 = scalar_lea.hbm %s1105_s0, %s570_s11  ;;  %s199_s24 = scalar_lea.vmem [#allocation3], %s548_s9 }
  0x35   : > { %s206_s21 = sshll.u32 %s199_s24, 4  ;;  %p993_p13 = pnand %p622_p12, %p966_p6  ;;  %s989_s21 = int_to_ptr.vmem [resolvable:$true] %s206_s21 }
  0x36   : > { %s997_s28 = scalar_lea.sflag [#allocation4], %s195_s29  ;;  %s722_s6 = scalar_lea.hbm %s987_s14, 256 }
  0x37   : > { %p723_p0 = scmp.ne.s32.totalorder %s987_s14, %s722_s6  ;;  %p724_p3 = pneg %p993_p13 }
  0x38   : > { %s727_s7 = scalar_lea.hbm %s1105_s0, 512  ;;  %p728_p9 = scmp.lt.u32.totalorder %s987_s14, %s1105_s0 }
  0x39   : > { %p725_p5 = pnand %p724_p3, %p723_p0  ;;  %p729_p1 = scmp.lt.u32.totalorder %s727_s7, %s722_s6 }
  0x3a   : > { %p731_p4 = scmp.lt.u32.totalorder %s722_s6, %s987_s14 }
  0x3b   : > { %p726_p7 = pneg %p725_p5  ;;  %p730_p2 = por %p729_p1, %p728_p9 }
  0x3d   : > { %p732_p6 = por %p731_p4, %p730_p2 }
  0x3f   : > { %p733_p8 = pnand %p732_p6, %p726_p7 }
  0x41   : > { %736 = shalt.err (!%p733_p8)
}
  0x42   : > { %s737_s29 = scalar_lea.vmem %s989_s21, 256  ;;  %s843_s13 = smov [#allocation3]  }
  0x43   : > { %p738_p12 = scmp.ne.s32.totalorder %s989_s21, %s737_s29  ;;  %s742_s24 = sshll.u32 %s843_s13, 4  ;;  %s743_s24 = int_to_ptr.vmem [resolvable:$false] %s742_s24 }
  0x44   : > { %s744_s30 = scalar_lea.vmem %s743_s24, 512  ;;  %p745_p5 = scmp.lt.s32.totalorder %s989_s21, %s743_s24 }
  0x45   : > { %p740_p11 = pnand %p738_p12, %p724_p3  ;;  %p746_p9 = scmp.lt.s32.totalorder %s744_s30, %s737_s29 }
  0x47   : > { %p741_p0 = pneg %p740_p11  ;;  %p747_p1 = por %p746_p9, %p745_p5 }
  0x49   : > { %p748_p2 = pnand %p747_p1, %p741_p0 }
  0x4b   : > { %751 = shalt.err (!%p748_p2)
}
  0x4c   : > { %s844_s6 = smov 128   ;;  %s845_s9 = smov 8  }
  0x4d   : > { %616 = dma.hbm_to_vmem [thread:$0]  (!%p993_p13), %s987_s14, 256, %s989_s21, %s997_s28, %s844_s6, %s844_s6, %s845_s9  }
  0x4e   : > { %p1124_p3 = scmp.ne.s32.totalorder %s1118_s27, 0 }
  0x4f   : > { %s1028_s7 = sand.u32 (!%p1124_p3), 1, %s822_s16   ;;  %p1125_p7 = scmp.ne.s32.totalorder (!%p1124_p3), %s1116_s25, 0 }
  0x50   : > { %218 = sbr.rel (%p1124_p3) target bundleno = 496 (0x1f0), region = 36  ;;  %s552_s11 = sshll.u32 (!%p1124_p3), %s1028_s7, 4 }
  0x51   : > { %s221_s12 = scalar_lea.sflag (!%p1124_p3), [#allocation4], %s1028_s7  ;;  %s224_s29 = scalar_lea.vmem (!%p1124_p3), [#allocation3], %s552_s11 }
  0x57   : > { %805 = dma.done.wait (%p1125_p7), %s221_s12, 256  }
  0x58   : > { %807 = vsyncadd (%p1125_p7), %s221_s12, 4294967040  ;;  %p1126_p13 = scmp.ne.s32.totalorder %s1114_s23, 0 }
  0x5a   : > { %809 = dma.done.wait (%p1126_p13), [#allocation7], 1024  }
  0x5b   : > { %811 = vsyncadd (%p1126_p13), [#allocation7], 4294966272  ;;  %v846_v0 = vmov 0.0   ;;  %v266_v1 = vld [vmem:[%s224_s29] sm:$0xff]  ;;  %v267_v2 = vld [vmem:[%s224_s29 + $0x8] sm:$0xff]  ;;  %vm847_vm0 = vmmov 0  }
  0x5c   : > { %581 = vmatprep.subr.bf16.mxu0 %v846_v0  ;;  %268 = vadd.xlane.f32.xlu0 %v266_v1  ;;  %v272_v3 = vmul.f32 %v266_v1, %v266_v1  ;;  %v273_v4 = vmul.f32 %v267_v2, %v267_v2  ;;  %v682_v5 = vld [vmem:[#allocation6] sm:$0xff]   ;;  %v683_v6 = vld [vmem:[#allocation6 + $0x8] sm:$0xff]   ;;  %v684_v7 = vld [vmem:[#allocation6 + $0x10] sm:$0xff]   ;;  %s255_s21 = scalar_lea.vmem [#allocation8], %s552_s11  ;;  %s571_s28 = sshll.u32 %s830_s18, 8 }
  0x5d   : > { %582 = vmatpush3.bf16.msra.mxu0 %v682_v5  ;;  %v685_v8 = vld [vmem:[#allocation6 + $0x18] sm:$0xff]   ;;  %v686_v9 = vld [vmem:[#allocation6 + $0x20] sm:$0xff]   ;;  %597 = vmatprep.mubr.msk.bf16.mxu0 %vm847_vm0, %v846_v0  ;;  %v687_v10 = vld [vmem:[#allocation6 + $0x28] sm:$0xff]   ;;  %s437_s22 = sshll.u32 %s255_s21, 4  ;;  %s1056_s30 = scalar_lea.hbm %s1109_s4, %s571_s28  ;;  %s1051_s22 = int_to_ptr.vmem [resolvable:$true] %s437_s22 }
  0x5e   : > { %274 = vadd.xlane.f32.xlu1 %v272_v3  ;;  %583 = vmatprep.subr.bf16.mxu0 %v846_v0  ;;  %v688_v11 = vld [vmem:[#allocation6 + $0x30] sm:$0xff]   ;;  %v689_v12 = vld [vmem:[#allocation6 + $0x38] sm:$0xff]   ;;  %v555_v30 = vld [vmem:[%s1106_s1] ss:$0 sm:$0xff]  ;;  %s423_s6 = scalar_lea.sflag [#allocation5], %s1028_s7  ;;  %s752_s18 = scalar_lea.vmem %s1051_s22, 256 }
  0x5f   : > { %v556_v39 = vld [vmem:[%s1108_s3] ss:$0 sm:$0xff]  ;;  %p753_p4 = scmp.ne.s32.totalorder %s1051_s22, %s752_s18  ;;  %s848_s9 = smov [#allocation8]  }
  0x60   : > { %270 = vadd.xlane.f32.xlu0 %v267_v2  ;;  %s756_s11 = sshll.u32 %s848_s9, 4  ;;  %s757_s11 = int_to_ptr.vmem [resolvable:$false] %s756_s11 }
  0x61   : > { %584 = vmatpush3.bf16.msra.mxu0 %v683_v6  ;;  %p754_p6 = pnand %p753_p4, %p972_p10  ;;  %s758_s12 = scalar_lea.vmem %s757_s11, 512 }
  0x62   : > { %276 = vadd.xlane.f32.xlu1 %v273_v4  ;;  %585 = vmatprep.subr.bf16.mxu0 %v846_v0  ;;  %p759_p12 = scmp.lt.s32.totalorder %s1051_s22, %s757_s11  ;;  %p760_p11 = scmp.lt.s32.totalorder %s758_s12, %s752_s18 }
  0x63   : > { %p755_p8 = pneg %p754_p6 }
  0x64   : > { %p761_p0 = por %p760_p11, %p759_p12 }
  0x65   : > { %586 = vmatpush3.bf16.msra.mxu0 %v684_v7 }
  0x66   : > { %587 = vmatprep.subr.bf16.mxu0 %v846_v0  ;;  %p762_p5 = pnand %p761_p0, %p755_p8 }
  0x69   : > { %588 = vmatpush3.bf16.msra.mxu0 %v685_v8 }
  0x6a   : > { %589 = vmatprep.subr.bf16.mxu0 %v846_v0 }
  0x6d   : > { %590 = vmatpush3.bf16.msra.mxu0 %v686_v9 }
  0x6e   : > { %591 = vmatprep.subr.bf16.mxu0 %v846_v0 }
  0x71   : > { %592 = vmatpush3.bf16.msra.mxu0 %v687_v10 }
  0x72   : > { %593 = vmatprep.subr.bf16.mxu0 %v846_v0 }
  0x75   : > { %594 = vmatpush3.bf16.msra.mxu0 %v688_v11 }
  0x76   : > { %595 = vmatprep.subr.bf16.mxu0 %v846_v0 }
  0x79   : > { %596 = vmatpush3.bf16.msra.mxu0 %v689_v12 }
  0xe9   : > { %v269_v13 = vpop.xlane.xlu0 %268 }
  0xea   : > { %v278_v14 = vmul.f32 0.03125, %v269_v13 }
  0xeb   : > { %v275_v15 = vpop.xlane.xlu1 %274 }
  0xec   : > { %v282_v16 = vmul.f32 %v278_v14, %v278_v14  ;;  %v280_v17 = vmul.f32 0.03125, %v275_v15  ;;  %v301_v33 = vsub.f32 %v266_v1, %v278_v14 }
  0xed   : > { %v271_v18 = vpop.xlane.xlu0 %270 }
  0xee   : > { %v284_v19 = vsub.f32 %v280_v17, %v282_v16  ;;  %v279_v20 = vmul.f32 0.03125, %v271_v18 }
  0xef   : > { %v277_v21 = vpop.xlane.xlu1 %276 }
  0xf0   : > { %v286_v22 = vmax.f32 %v284_v19, 0.0  ;;  %v283_v23 = vmul.f32 %v279_v20, %v279_v20  ;;  %v281_v24 = vmul.f32 0.03125, %v277_v21  ;;  %v302_v34 = vsub.f32 %v267_v2, %v279_v20 }
  0xf2   : > { %v288_v25 = vadd.f32 1e-05, %v286_v22  ;;  %v285_v26 = vsub.f32 %v281_v24, %v283_v23 }
  0xf4   : > { %690 = vrsqrt.f32 %v288_v25  ;;  %v287_v27 = vmax.f32 %v285_v26, 0.0 }
  0xf6   : > { %v289_v28 = vadd.f32 1e-05, %v287_v27 }
  0xf8   : > { %692 = vrsqrt.f32 %v289_v28 }
  0xfe   : > { %v691_v29 = vpop.eup %690 }
  0xff   : > { %v299_v31 = vmul.f32 %v691_v29, %v555_v30 }
 0x101   : > { %v303_v36 = vmul.f32 %v301_v33, %v299_v31 }
 0x102   : > { %v693_v32 = vpop.eup %692 }
 0x103   : > { %v300_v35 = vmul.f32 %v693_v32, %v555_v30 }
 0x105   : > { %v304_v37 = vmul.f32 %v302_v34, %v300_v35 }
 0x107   : > { %v305_v38 = vpack.c.bf16 %v304_v37, %v303_v36 }
 0x109   : > { %598 = vmatmul.mubr.bf16.vlgmr.msra.gmra.mrb[0].mxu0 %v305_v38 }
 0x1dc   : > { %v413_v40 = vpop.f32.mrb[0].mxu0 }
 0x1dd   : > { %v414_v41 = vadd.f32 %v556_v39, %v413_v40  ;;  %v599_v42 = vpop.f32.mrb[1].mxu0 }
 0x1de   : > { %v416_v43 = vpop.f32.mrb[2].mxu0 }
 0x1df   : > { %420 = vst [vmem:[%s255_s21] sm:$0xff] %v414_v41  ;;  %v417_v44 = vadd.f32 %v556_v39, %v416_v43  ;;  %v600_v45 = vpop.f32.mrb[3].mxu0 }
 0x1e1   : > { %421 = vst [vmem:[%s255_s21 + $0x8] sm:$0xff] %v417_v44 }
 0x1e2   : > { %765 = shalt.err (!%p762_p5)
}
 0x1e3   : > { %s766_s29 = scalar_lea.hbm %s1056_s30, 256  ;;  %s770_s27 = scalar_lea.hbm %s1109_s4, 512 }
 0x1e4   : > { %p767_p9 = scmp.ne.s32.totalorder %s1056_s30, %s766_s29  ;;  %p771_p3 = scmp.lt.u32.totalorder %s1056_s30, %s1109_s4 }
 0x1e5   : > { %p772_p7 = scmp.lt.u32.totalorder %s770_s27, %s766_s29  ;;  %p774_p4 = scmp.lt.u32.totalorder %s766_s29, %s1056_s30 }
 0x1e6   : > { %p768_p1 = pnand %p767_p9, %p972_p10 }
 0x1e7   : > { %p773_p13 = por %p772_p7, %p771_p3 }
 0x1e8   : > { %p769_p2 = pneg %p768_p1 }
 0x1e9   : > { %p775_p6 = por %p774_p4, %p773_p13 }
 0x1eb   : > { %p776_p8 = pnand %p775_p6, %p769_p2 }
 0x1ed   : > { %779 = shalt.err (!%p776_p8)
}
 0x1ee   : > { %s849_s28 = smov 128   ;;  %s850_s13 = smov 8  }
 0x1ef   : > { %607 = dma.vmem_to_hbm [thread:$0]  (%p972_p10), %s1051_s22, 256, %s1056_s30, %s423_s6, %s849_s28, %s849_s28, %s850_s13  }
 0x1f0 PF: > { %s452_s24 = sand.u32 1, %s818_s15   ;;  %p1127_p12 = scmp.ne.s32.totalorder %s1117_s26, 0 }
 0x1f1   : > { %p1128_p11 = scmp.ge.s32.totalorder %s838_s20, 2  ;;  %s453_s18 = scalar_lea.sflag [#allocation5], %s452_s24 }
 0x1f3   : > { %p618_p0 = pnand %p1128_p11, %p1127_p12 }
 0x1f5   : > { %813 = dma.done.wait (!%p618_p0), %s453_s18, 256  }
 0x1f6   : > { %815 = vsyncadd (!%p618_p0), %s453_s18, 4294967040  ;;  %s21_s20 = sadd.s32 1, %s838_s20   ;;  %s1129_s15 = smov %s822_s16 }
 0x1f7   : > { %p18_p5 = scmp.ge.s32.totalorder %s21_s20, 4   ;;  %s1130_s16 = smov %s826_s17 }
 0x1f8   : > { %s1131_s17 = smov %s981_s10  ;;  %s1132_s18 = smov %s834_s19 }
 0x1f9   : > { %s1133_s19 = smov %s1135_s5  ;;  %20 = sbr.rel (!%p18_p5) target bundleno = 7 (0x7), region = 92 }
 0x200   :  { %458 = vsyncpa [#allocation4], 1 }
 0x201   :  { %460 = vsyncpa [#allocation4 + $0x1], 1 }
 0x202   :  { %461 = vsyncpa [#allocation7], 1 }
 0x203   :  { %462 = vsyncpa [#allocation5], 1 }
 0x204   :  { %464 = vsyncpa [#allocation5 + $0x1], 1 }

</bundles_post_ra>
